<compile_context>
chip_gen: v6e
topology: v6e:2x2x1
jax: 0.10.0
libtpu: 0.0.40
codegen_flags: <defaults>
</compile_context>

<pallas_src>
import jax
import jax.numpy as jnp
from jax.experimental import pallas as pl
from jax.experimental.pallas import tpu as pltpu


def _round_up(x, m):
    return ((x + m - 1) // m) * m


# ----------------------------- Pallas kernel --------------------------------
def combined_kernel(
    beta_ref,      # SMEM (1, 1) f32   -- learnable blend parameter
    xf_ref,        # [tm, Ff]   bf16   flow node features (row tile)
    adj_ref,       # [tm, tk]   bf16   row-normalized adjacency (row x host tile)
    hhost_ref,     # [tk, Hp]   bf16   precomputed Xh @ Whost   (host tile)
    w_xf_ref,      # [Ff, 2Hp]  bf16   packed [w_self | w1] (each half 128-aligned)
    w_l2_ref,      # [2Hp, Cp]  bf16   packed [w_gnn2 ; w2] (each half 128-aligned)
    b_slab_ref,    # [1, Hp+2Cp] f32   packed [b1 | b_gnn2 | b2]
    out_ref,       # [tm, Cp]   f32    lane-dense output tile
    msg_acc,       # [tm, Hp]   f32    VMEM scratch: host-message accumulator
):
    hp = hhost_ref.shape[1]
    cp = out_ref.shape[1]
    k = pl.program_id(1)

    @pl.when(k == 0)
    def _():
        msg_acc[...] = jnp.zeros_like(msg_acc)

    # ---- hetero aggregation (K-tiled over hosts): msg += A_tile @ h_host_tile
    msg_acc[...] += jnp.dot(adj_ref[...], hhost_ref[...],
                            preferred_element_type=jnp.float32)

    @pl.when(k == pl.num_programs(1) - 1)
    def _():
        beta = beta_ref[0, 0]

        # fused first layer for both branches: ONE MXU pass over xf
        h_fused = jnp.dot(xf_ref[...], w_xf_ref[...],
                          preferred_element_type=jnp.float32)     # [tm, 2Hp]
        h_self_pre = h_fused[:, :hp]        # GNN self term  (128-aligned slice)
        h_mlp_pre = h_fused[:, hp:]         # MLP layer-1 pre-act

        # bias slab slices (all 128-lane aligned -> free)
        b1 = b_slab_ref[:, :hp]
        b_gnn2 = b_slab_ref[:, hp:hp + cp]
        b2 = b_slab_ref[:, hp + cp:]

        h_gnn = jnp.maximum(h_self_pre + msg_acc[...], 0.0)       # [tm, Hp]
        h_mlp = jnp.maximum(h_mlp_pre + b1, 0.0)                  # [tm, Hp]

        # second layer + beta blend: fold beta into the weights (small VPU
        # scale on [Hp, Cp]) and use two accumulating dots -- no concat.
        w_l2 = w_l2_ref[...]
        w_gnn_half = w_l2[:hp, :] * beta                          # f32
        w_mlp_half = w_l2[hp:, :] * (1.0 - beta)                  # f32

        out = jnp.dot(h_gnn, w_gnn_half, preferred_element_type=jnp.float32)
        out = out + jnp.dot(h_mlp, w_mlp_half,
                            preferred_element_type=jnp.float32)
        out_ref[...] = out + (beta * b_gnn2 + (1.0 - beta) * b2)


# ------------------------------ wrapper --------------------------------------
def combined_hetero_forward(beta, xf, xh, adj, params, *,
                            row_tile=256, host_tile=512,
                            compute_dtype=jnp.bfloat16):
    (w_self, w_host, w_gnn2, b_gnn2, w1, b1, w2, b2) = params
    n_flow, f_flow = xf.shape
    n_host, f_host = xh.shape
    hidden = w_self.shape[1]
    out_channels = w_gnn2.shape[1]
    cd = compute_dtype

    # ---- lane-aligned padded widths --------------------------------------
    hp = _round_up(hidden, 128)          # hidden, padded to a vreg lane tile
    cp = _round_up(out_channels, 128)    # output channels, lane-dense stores

    # ---- row tiling over flow nodes (pad, never collapse) -----------------
    if n_flow <= row_tile:
        row_tile = _round_up(n_flow, 8)
    else:
        row_tile = _round_up(row_tile, 8)
    n_flow_pad = _round_up(n_flow, row_tile)

    # ---- host (reduction) tiling ------------------------------------------
    if n_host <= host_tile:
        host_tile = _round_up(n_host, 8)         # single K tile == full dim
    else:
        host_tile = _round_up(host_tile, 128)    # lane-dim tiling -> x128
    n_host_pad = _round_up(n_host, host_tile)

    # ---- layout plumbing (outside the kernel) ------------------------------
    # hoisted host projection: computed ONCE, passed as [Nh_pad, Hp]
    h_host = jnp.dot(xh.astype(cd), w_host.astype(cd),
                     preferred_element_type=jnp.float32)
    h_host_p = jnp.zeros((n_host_pad, hp), cd).at[:n_host, :hidden].set(
        h_host.astype(cd))

    xf_p = jnp.zeros((n_flow_pad, f_flow), cd).at[:n_flow].set(xf.astype(cd))
    adj_p = jnp.zeros((n_flow_pad, n_host_pad), cd).at[:n_flow, :n_host].set(
        adj.astype(cd))

    w_xf = jnp.zeros((f_flow, 2 * hp), cd)
    w_xf = w_xf.at[:, :hidden].set(w_self.astype(cd))
    w_xf = w_xf.at[:, hp:hp + hidden].set(w1.astype(cd))

    w_l2 = jnp.zeros((2 * hp, cp), cd)
    w_l2 = w_l2.at[:hidden, :out_channels].set(w_gnn2.astype(cd))
    w_l2 = w_l2.at[hp:hp + hidden, :out_channels].set(w2.astype(cd))

    b_slab = jnp.zeros((1, hp + 2 * cp), jnp.float32)
    b_slab = b_slab.at[:, :hidden].set(b1)
    b_slab = b_slab.at[:, hp:hp + out_channels].set(b_gnn2)
    b_slab = b_slab.at[:, hp + cp:hp + cp + out_channels].set(b2)

    beta_arr = jnp.asarray(beta, jnp.float32).reshape(1, 1)

    grid = (n_flow_pad // row_tile, n_host_pad // host_tile)

    # ---- explicit VMEM budget + cost estimate -------------------------------
    itemsize = jnp.dtype(cd).itemsize
    step_bytes = (
        2 * itemsize * (row_tile * f_flow + row_tile * host_tile
                        + host_tile * hp + f_flow * 2 * hp + 2 * hp * cp)
        + 2 * 4 * (hp + 2 * cp)
        + 2 * 4 * row_tile * cp
        + 4 * row_tile * hp)
    vmem_limit = int(min(64 * 1024 * 1024,
                         max(32 * 1024 * 1024, 2 * step_bytes)))

    flops = (2 * n_flow_pad * f_flow * (2 * hp)
             + 2 * n_flow_pad * n_host_pad * hp
             + 2 * 2 * n_flow_pad * hp * cp)
    bytes_accessed = (itemsize * (xf_p.size + adj_p.size + h_host_p.size
                                  + w_xf.size + w_l2.size)
                      + 4 * b_slab.size + 4 * n_flow_pad * cp)
    cost = pl.CostEstimate(flops=flops, transcendentals=0,
                           bytes_accessed=bytes_accessed)

    out_padded = pl.pallas_call(
        combined_kernel,
        out_shape=jax.ShapeDtypeStruct((n_flow_pad, cp), jnp.float32),
        grid=grid,
        in_specs=[
            pl.BlockSpec(memory_space=pltpu.SMEM),                       # beta
            pl.BlockSpec((row_tile, f_flow), lambda i, k: (i, 0)),       # xf
            pl.BlockSpec((row_tile, host_tile), lambda i, k: (i, k)),    # adj
            pl.BlockSpec((host_tile, hp), lambda i, k: (k, 0)),          # h_host
            pl.BlockSpec((f_flow, 2 * hp), lambda i, k: (0, 0)),         # w_xf
            pl.BlockSpec((2 * hp, cp), lambda i, k: (0, 0)),             # w_l2
            pl.BlockSpec((1, hp + 2 * cp), lambda i, k: (0, 0)),         # b_slab
        ],
        out_specs=pl.BlockSpec((row_tile, cp), lambda i, k: (i, 0)),
        scratch_shapes=[pltpu.VMEM((row_tile, hp), jnp.float32)],
        compiler_params=pltpu.CompilerParams(
            dimension_semantics=("parallel", "arbitrary"),
            vmem_limit_bytes=vmem_limit),
        cost_estimate=cost,
    )(beta_arr, xf_p, adj_p, h_host_p, w_xf, w_l2, b_slab)

    return out_padded[:n_flow, :out_channels]


# --------------------------- reference (plain JAX, f32) -----------------------
def reference_forward(beta, xf, xh, adj, params):
    (w_self, w_host, w_gnn2, b_gnn2, w1, b1, w2, b2) = params
    h_gnn = jnp.maximum(xf @ w_self + adj @ (xh @ w_host), 0.0)
    gnn_out = h_gnn @ w_gnn2 + b_gnn2
    mlp_out = jnp.maximum(xf @ w1 + b1, 0.0) @ w2 + b2
    return beta * gnn_out + (1.0 - beta) * mlp_out


if __name__ == "__main__":
    # Small shapes consistent with the forward pass.
    N_FLOW, N_HOST = 8, 8          # nodes of each type
    F_FLOW, F_HOST = 32, 32        # input feature widths
    HIDDEN = 32                    # GNN / MLP hidden width
    OUT_CHANNELS = 16              # out_channels of CombinedHeteroModel

    key = jax.random.PRNGKey(0)
    keys = jax.random.split(key, 12)

    xf = jax.random.normal(keys[0], (N_FLOW, F_FLOW), jnp.float32)
    xh = jax.random.normal(keys[1], (N_HOST, F_HOST), jnp.float32)

    # edge_index_dict -> dense row-normalized adjacency (mean aggregation).
    adj_raw = (jax.random.uniform(keys[2], (N_FLOW, N_HOST)) > 0.5).astype(jnp.float32)
    deg = jnp.maximum(adj_raw.sum(axis=1, keepdims=True), 1.0)
    adj = adj_raw / deg

    def init(k, shape, fan_in):
        return jax.random.normal(k, shape, jnp.float32) * (1.0 / jnp.sqrt(fan_in))

    w_self = init(keys[3], (F_FLOW, HIDDEN), F_FLOW)
    w_host = init(keys[4], (F_HOST, HIDDEN), F_HOST)
    w_gnn2 = init(keys[5], (HIDDEN, OUT_CHANNELS), HIDDEN)
    w1 = init(keys[6], (F_FLOW, HIDDEN), F_FLOW)
    w2 = init(keys[7], (HIDDEN, OUT_CHANNELS), HIDDEN)
    b_gnn2 = 0.1 * jax.random.normal(keys[8], (1, OUT_CHANNELS), jnp.float32)
    b1 = 0.1 * jax.random.normal(keys[9], (1, HIDDEN), jnp.float32)
    b2 = 0.1 * jax.random.normal(keys[10], (1, OUT_CHANNELS), jnp.float32)

    params = (w_self, w_host, w_gnn2, b_gnn2, w1, b1, w2, b2)
    beta = 0.5  # nn.Parameter(torch.tensor(0.5)) at init

    out = combined_hetero_forward(beta, xf, xh, adj, params)
    out = jax.block_until_ready(out)

    ref = reference_forward(beta, xf, xh, adj, params)
    assert out.shape == (N_FLOW, OUT_CHANNELS)
    # bf16 inputs (f32 accumulation) -> loosened tolerance vs the f32 reference.
    assert jnp.allclose(out, ref, atol=5e-2, rtol=5e-2), (
        float(jnp.max(jnp.abs(out - ref))))

    print("KERNEL_OK")
</pallas_src>

<mosaic_0001>
module attributes {stable_mosaic.version = 11 : i64} {
  func.func @combined_kernel(%arg0: i32, %arg1: i32, %arg2: memref<1x1xf32, #tpu.memory_space<smem>>, %arg3: memref<8x32xbf16, #tpu.memory_space<vmem>>, %arg4: memref<8x8xbf16, #tpu.memory_space<vmem>>, %arg5: memref<8x128xbf16, #tpu.memory_space<vmem>>, %arg6: memref<32x256xbf16, #tpu.memory_space<vmem>>, %arg7: memref<256x128xbf16, #tpu.memory_space<vmem>>, %arg8: memref<1x384xf32, #tpu.memory_space<vmem>>, %arg9: memref<8x128xf32, #tpu.memory_space<vmem>>, %arg10: memref<8x128xf32, #tpu.memory_space<vmem>>) attributes {dimension_semantics = [#tpu.dimension_semantics<parallel>, #tpu.dimension_semantics<arbitrary>], iteration_bounds = array<i64: 1, 1>, scalar_prefetch = 0 : i64, scratch_operands = 1 : i64, tpu.core_type = #tpu.core_type<tc>, window_params = [{transform_indices = @transform_0, window_bounds = array<i64: 1, 1>}, {transform_indices = @transform_1, window_bounds = array<i64: 8, 32>}, {transform_indices = @transform_2, window_bounds = array<i64: 8, 8>}, {transform_indices = @transform_3, window_bounds = array<i64: 8, 128>}, {pipeline_mode = #tpu.pipeline_mode<synchronous>, transform_indices = @transform_4, window_bounds = array<i64: 32, 256>}, {pipeline_mode = #tpu.pipeline_mode<synchronous>, transform_indices = @transform_5, window_bounds = array<i64: 256, 128>}, {pipeline_mode = #tpu.pipeline_mode<synchronous>, transform_indices = @transform_6, window_bounds = array<i64: 1, 384>}, {transform_indices = @transform_7, window_bounds = array<i64: 8, 128>}]} {
    %c0_i32 = arith.constant 0 : i32
    %0 = arith.cmpi eq, %arg1, %c0_i32 : i32
    %1 = arith.extui %0 : i1 to i32
    %c0_i32_0 = arith.constant 0 : i32
    %2 = arith.cmpi ne, %1, %c0_i32_0 : i32
    scf.if %2 {
      %cst_10 = arith.constant 0.000000e+00 : f32
      %12 = vector.broadcast %cst_10 : f32 to vector<8x128xf32>
      %c0_11 = arith.constant 0 : index
      %c0_12 = arith.constant 0 : index
      %13 = vector.load %arg10[%c0_11, %c0_12] : memref<8x128xf32, #tpu.memory_space<vmem>>, vector<8x128xf32>
      tpu.vector_store %arg10[%c0_11, %c0_12], %12 {strides = array<i32>} : memref<8x128xf32, #tpu.memory_space<vmem>>, vector<8x128xf32>,
    } else {
    }
    %c0 = arith.constant 0 : index
    %c0_1 = arith.constant 0 : index
    %3 = vector.load %arg10[%c0, %c0_1] : memref<8x128xf32, #tpu.memory_space<vmem>>, vector<8x128xf32>
    %c0_2 = arith.constant 0 : index
    %c0_3 = arith.constant 0 : index
    %4 = vector.load %arg4[%c0_2, %c0_3] : memref<8x8xbf16, #tpu.memory_space<vmem>>, vector<8x8xbf16>
    %c0_4 = arith.constant 0 : index
    %c0_5 = arith.constant 0 : index
    %5 = vector.load %arg5[%c0_4, %c0_5] : memref<8x128xbf16, #tpu.memory_space<vmem>>, vector<8x128xbf16>
    %cst = arith.constant dense<0.000000e+00> : vector<8x128xf32>
    %6 = tpu.matmul %4, %5, %cst {dimension_numbers = #tpu.dot_dimension_numbers<[1], [0], [0], [1], [0, 0, 1, 1], [], []>} : vector<8x8xbf16>, vector<8x128xbf16>, vector<8x128xf32> -> vector<8x128xf32>
    %7 = arith.addf %3, %6 : vector<8x128xf32>
    %c0_6 = arith.constant 0 : index
    %c0_7 = arith.constant 0 : index
    %8 = vector.load %arg10[%c0_6, %c0_7] : memref<8x128xf32, #tpu.memory_space<vmem>>, vector<8x128xf32>
    tpu.vector_store %arg10[%c0_6, %c0_7], %7 {strides = array<i32>} : memref<8x128xf32, #tpu.memory_space<vmem>>, vector<8x128xf32>,
    %c0_i32_8 = arith.constant 0 : i32
    %9 = arith.cmpi eq, %arg1, %c0_i32_8 : i32
    %10 = arith.extui %9 : i1 to i32
    %c0_i32_9 = arith.constant 0 : i32
    %11 = arith.cmpi ne, %10, %c0_i32_9 : i32
    scf.if %11 {
      %c0_10 = arith.constant 0 : index
      %c0_11 = arith.constant 0 : index
      %12 = memref.load %arg2[%c0_10, %c0_11] : memref<1x1xf32, #tpu.memory_space<smem>>
      %c0_12 = arith.constant 0 : index
      %c0_13 = arith.constant 0 : index
      %13 = vector.load %arg3[%c0_12, %c0_13] : memref<8x32xbf16, #tpu.memory_space<vmem>>, vector<8x32xbf16>
      %c0_14 = arith.constant 0 : index
      %c0_15 = arith.constant 0 : index
      %14 = vector.load %arg6[%c0_14, %c0_15] : memref<32x256xbf16, #tpu.memory_space<vmem>>, vector<32x256xbf16>
      %cst_16 = arith.constant dense<0.000000e+00> : vector<8x256xf32>
      %15 = tpu.matmul %13, %14, %cst_16 {dimension_numbers = #tpu.dot_dimension_numbers<[1], [0], [0], [1], [0, 0, 1, 1], [], []>} : vector<8x32xbf16>, vector<32x256xbf16>, vector<8x256xf32> -> vector<8x256xf32>
      %16 = vector.extract_strided_slice %15 {offsets = [0, 0], sizes = [8, 128], strides = [1, 1]} : vector<8x256xf32> to vector<8x128xf32>
      %17 = vector.extract_strided_slice %15 {offsets = [0, 128], sizes = [8, 128], strides = [1, 1]} : vector<8x256xf32> to vector<8x128xf32>
      %c0_17 = arith.constant 0 : index
      %c0_18 = arith.constant 0 : index
      %18 = vector.load %arg8[%c0_17, %c0_18] : memref<1x384xf32, #tpu.memory_space<vmem>>, vector<1x128xf32>
      %c0_19 = arith.constant 0 : index
      %c128 = arith.constant 128 : index
      %19 = vector.load %arg8[%c0_19, %c128] : memref<1x384xf32, #tpu.memory_space<vmem>>, vector<1x128xf32>
      %c0_20 = arith.constant 0 : index
      %c256 = arith.constant 256 : index
      %20 = vector.load %arg8[%c0_20, %c256] : memref<1x384xf32, #tpu.memory_space<vmem>>, vector<1x128xf32>
      %c0_21 = arith.constant 0 : index
      %c0_22 = arith.constant 0 : index
      %21 = vector.load %arg10[%c0_21, %c0_22] : memref<8x128xf32, #tpu.memory_space<vmem>>, vector<8x128xf32>
      %22 = arith.addf %16, %21 : vector<8x128xf32>
      %cst_23 = arith.constant 0.000000e+00 : f32
      %23 = vector.broadcast %cst_23 : f32 to vector<8x128xf32>
      %24 = arith.maximumf %22, %23 : vector<8x128xf32>
      %25 = vector.broadcast %18 : vector<1x128xf32> to vector<8x128xf32>
      %26 = arith.addf %17, %25 : vector<8x128xf32>
      %cst_24 = arith.constant 0.000000e+00 : f32
      %27 = vector.broadcast %cst_24 : f32 to vector<8x128xf32>
      %28 = arith.maximumf %26, %27 : vector<8x128xf32>
      %c0_25 = arith.constant 0 : index
      %c0_26 = arith.constant 0 : index
      %29 = vector.load %arg7[%c0_25, %c0_26] : memref<256x128xbf16, #tpu.memory_space<vmem>>, vector<256x128xbf16>
      %30 = vector.extract_strided_slice %29 {offsets = [0, 0], sizes = [128, 128], strides = [1, 1]} : vector<256x128xbf16> to vector<128x128xbf16>
      %31 = arith.extf %30 : vector<128x128xbf16> to vector<128x128xf32>
      %32 = vector.broadcast %12 : f32 to vector<128x128xf32>
      %33 = arith.mulf %31, %32 : vector<128x128xf32>
      %34 = vector.extract_strided_slice %29 {offsets = [128, 0], sizes = [128, 128], strides = [1, 1]} : vector<256x128xbf16> to vector<128x128xbf16>
      %cst_27 = arith.constant 1.000000e+00 : f32
      %35 = arith.subf %cst_27, %12 : f32
      %36 = arith.extf %34 : vector<128x128xbf16> to vector<128x128xf32>
      %37 = vector.broadcast %35 : f32 to vector<128x128xf32>
      %38 = arith.mulf %36, %37 : vector<128x128xf32>
      %cst_28 = arith.constant dense<0.000000e+00> : vector<8x128xf32>
      %39 = tpu.matmul %24, %33, %cst_28 {dimension_numbers = #tpu.dot_dimension_numbers<[1], [0], [0], [1], [0, 0, 1, 1], [], []>} : vector<8x128xf32>, vector<128x128xf32>, vector<8x128xf32> -> vector<8x128xf32>
      %cst_29 = arith.constant dense<0.000000e+00> : vector<8x128xf32>
      %40 = tpu.matmul %28, %38, %cst_29 {dimension_numbers = #tpu.dot_dimension_numbers<[1], [0], [0], [1], [0, 0, 1, 1], [], []>} : vector<8x128xf32>, vector<128x128xf32>, vector<8x128xf32> -> vector<8x128xf32>
      %41 = arith.addf %39, %40 : vector<8x128xf32>
      %42 = vector.broadcast %12 : f32 to vector<1x128xf32>
      %43 = arith.mulf %42, %19 : vector<1x128xf32>
      %cst_30 = arith.constant 1.000000e+00 : f32
      %44 = arith.subf %cst_30, %12 : f32
      %45 = vector.broadcast %44 : f32 to vector<1x128xf32>
      %46 = arith.mulf %45, %20 : vector<1x128xf32>
      %47 = arith.addf %43, %46 : vector<1x128xf32>
      %48 = vector.broadcast %47 : vector<1x128xf32> to vector<8x128xf32>
      %49 = arith.addf %41, %48 : vector<8x128xf32>
      %c0_31 = arith.constant 0 : index
      %c0_32 = arith.constant 0 : index
      %50 = vector.load %arg9[%c0_31, %c0_32] : memref<8x128xf32, #tpu.memory_space<vmem>>, vector<8x128xf32>
      tpu.vector_store %arg9[%c0_31, %c0_32], %49 {strides = array<i32>} : memref<8x128xf32, #tpu.memory_space<vmem>>, vector<8x128xf32>,
    } else {
    }
    return
  }
  func.func @transform_0(%arg0: i32, %arg1: i32) -> (i32, i32) {
    %c0_i32 = arith.constant 0 : i32
    %c0_i32_0 = arith.constant 0 : i32
    %c0_i32_1 = arith.constant 0 : i32
    return %c0_i32, %c0_i32_0 : i32, i32
  }
  func.func @transform_1(%arg0: i32, %arg1: i32) -> (i32, i32) {
    %c0_i32 = arith.constant 0 : i32
    %c0_i32_0 = arith.constant 0 : i32
    return %arg0, %c0_i32 : i32, i32
  }
  func.func @transform_2(%arg0: i32, %arg1: i32) -> (i32, i32) {
    %c0_i32 = arith.constant 0 : i32
    return %arg0, %arg1 : i32, i32
  }
  func.func @transform_3(%arg0: i32, %arg1: i32) -> (i32, i32) {
    %c0_i32 = arith.constant 0 : i32
    %c0_i32_0 = arith.constant 0 : i32
    return %arg1, %c0_i32 : i32, i32
  }
  func.func @transform_4(%arg0: i32, %arg1: i32) -> (i32, i32) {
    %c0_i32 = arith.constant 0 : i32
    %c0_i32_0 = arith.constant 0 : i32
    %c0_i32_1 = arith.constant 0 : i32
    return %c0_i32, %c0_i32_0 : i32, i32
  }
  func.func @transform_5(%arg0: i32, %arg1: i32) -> (i32, i32) {
    %c0_i32 = arith.constant 0 : i32
    %c0_i32_0 = arith.constant 0 : i32
    %c0_i32_1 = arith.constant 0 : i32
    return %c0_i32, %c0_i32_0 : i32, i32
  }
  func.func @transform_6(%arg0: i32, %arg1: i32) -> (i32, i32) {
    %c0_i32 = arith.constant 0 : i32
    %c0_i32_0 = arith.constant 0 : i32
    %c0_i32_1 = arith.constant 0 : i32
    return %c0_i32, %c0_i32_0 : i32, i32
  }
  func.func @transform_7(%arg0: i32, %arg1: i32) -> (i32, i32) {
    %c0_i32 = arith.constant 0 : i32
    %c0_i32_0 = arith.constant 0 : i32
    return %arg0, %c0_i32 : i32, i32
  }
}

</mosaic_0001>

<bundles_post_ra>
// kernel: tpu_custom_call.1
= control target key start
LH: loop header
LB: loop body
LE: loop exit
PB: predicated region body
PF: predicated region fallthrough
CT: control target
= control target key end

     0   :  { %13 = vsyncpa [#allocation5], 0  ;;  %s980_s0 = inlined_call_operand.<no memory space> [shape: f32[1,1], index: 0, kind: input, shape index: {}]   ;;  %s981_s1 = inlined_call_operand.hbm [shape: bf16[8,32], index: 1, kind: input, shape index: {}]   ;;  %s982_s2 = inlined_call_operand.hbm [shape: bf16[8,8], index: 2, kind: input, shape index: {}]   ;;  %s983_s3 = inlined_call_operand.vmem [shape: bf16[8,128], index: 3, kind: input, shape index: {}]   ;;  %s984_s4 = inlined_call_operand.hbm [shape: bf16[32,256], index: 4, kind: input, shape index: {}]   ;;  %s985_s5 = inlined_call_operand.hbm [shape: bf16[256,128], index: 5, kind: input, shape index: {}]   ;;  %s986_s6 = inlined_call_operand.vmem [shape: f32[1,384], index: 6, kind: input, shape index: {}]   ;;  %s987_s7 = inlined_call_operand.hbm [shape: f32[8,128], index: 7, kind: output, shape index: {}]  }
   0x1   :  { %14 = vsyncpa [#allocation8], 0 }
   0x2   :  { %15 = vsyncpa [#allocation11], 0 }
   0x3   :  { %16 = vsyncpa [#allocation6], 0  ;;  %s817_s24 = smov [#allocation7]   ;;  %s818_s26 = smov [#allocation4]  }
   0x4   :  { %s35_s25 = sshll.u32 %s817_s24, 4  ;;  %s25_s27 = sshll.u32 %s818_s26, 4  ;;  %s36_s25 = int_to_ptr.vmem [resolvable:$true] %s35_s25  ;;  %s26_s27 = int_to_ptr.vmem [resolvable:$true] %s25_s27 }
   0x5   :  { %s717_s28 = scalar_lea.vmem %s36_s25, 64  ;;  %p722_p1 = scmp.lt.s32.totalorder %s36_s25, %s36_s25 }
   0x6   :  { %p718_p0 = scmp.ne.s32.totalorder %s36_s25, %s717_s28  ;;  %p723_p2 = scmp.lt.s32.totalorder %s717_s28, %s717_s28 }
   0x8   :  { %p724_p3 = por %p723_p2, %p722_p1 }
   0xa   :  { %p725_p4 = pnand %p724_p3, %p718_p0 }
   0xc   :  { %728 = shalt.err (!%p725_p4)
}
   0xd   :  { %38 = dma.hbm_to_vmem [thread:$0]  %s982_s2, 64, %s36_s25, [#allocation8]  }
   0xe   :  { %s737_s8 = scalar_lea.vmem %s26_s27, 64  ;;  %p742_p6 = scmp.lt.s32.totalorder %s26_s27, %s26_s27 }
   0xf   :  { %p738_p5 = scmp.ne.s32.totalorder %s26_s27, %s737_s8  ;;  %p743_p7 = scmp.lt.s32.totalorder %s737_s8, %s737_s8 }
  0x11   :  { %p744_p8 = por %p743_p7, %p742_p6 }
  0x13   :  { %p745_p9 = pnand %p744_p8, %p738_p5 }
  0x15   :  { %748 = shalt.err (!%p745_p9)
}
  0x16   :  { %28 = dma.hbm_to_vmem [thread:$0]  %s981_s1, 64, %s26_s27, [#allocation5]  }
  0x17   :  { %s819_s11 = smov [#allocation9]  }
  0x18   :  { %s46_s12 = sshll.u32 %s819_s11, 4  ;;  %s47_s12 = int_to_ptr.vmem [resolvable:$true] %s46_s12 }
  0x19   :  { %s757_s13 = scalar_lea.vmem %s47_s12, 512  ;;  %p762_p11 = scmp.lt.s32.totalorder %s47_s12, %s47_s12 }
  0x1a   :  { %p758_p10 = scmp.ne.s32.totalorder %s47_s12, %s757_s13  ;;  %p763_p12 = scmp.lt.s32.totalorder %s757_s13, %s757_s13 }
  0x1c   :  { %p764_p13 = por %p763_p12, %p762_p11 }
  0x1e   :  { %p765_p0 = pnand %p764_p13, %p758_p10 }
  0x20   :  { %768 = shalt.err (!%p765_p0)
}
  0x21   :  { %s820_s2 = smov 128   ;;  %s821_s14 = smov 8  }
  0x22   :  { %52 = dma.hbm_to_vmem [thread:$0]  %s984_s4, 512, %s47_s12, [#allocation8], %s820_s2, %s820_s2, %s821_s14  }
  0x23   :  { %s822_s17 = smov [#allocation10]  }
  0x24   :  { %s58_s18 = sshll.u32 %s822_s17, 4  ;;  %s59_s18 = int_to_ptr.vmem [resolvable:$true] %s58_s18 }
  0x25   :  { %s777_s1 = scalar_lea.vmem %s59_s18, 2048  ;;  %p782_p2 = scmp.lt.s32.totalorder %s59_s18, %s59_s18 }
  0x26   :  { %p778_p1 = scmp.ne.s32.totalorder %s59_s18, %s777_s1  ;;  %p783_p3 = scmp.lt.s32.totalorder %s777_s1, %s777_s1 }
  0x28   :  { %p784_p4 = por %p783_p3, %p782_p2 }
  0x2a   :  { %p785_p5 = pnand %p784_p4, %p778_p1 }
  0x2c   :  { %788 = shalt.err (!%p785_p5)
}
  0x2d   :  { %s823_s19 = smov 64   ;;  %s824_s20 = smov 4  }
  0x2e   :  { %64 = dma.hbm_to_vmem [thread:$0]  %s985_s5, 2048, %s59_s18, [#allocation11], %s823_s19, %s823_s19, %s824_s20  }
  0x2f   :  { %809 = dma.done.wait [#allocation5], 64  }
  0x30   :  { %810 = vsyncadd [#allocation5], 4294967232 }
  0x31   :  { %811 = dma.done.wait [#allocation8], 576  }
  0x32   :  { %812 = vsyncadd [#allocation8], 4294966720 }
  0x33   :  { %813 = dma.done.wait [#allocation11], 2048  }
  0x34   :  { %814 = vsyncadd [#allocation11], 4294965248  ;;  %v825_v0 = vmov 0.0   ;;  %vm826_vm0 = vmmov 0   ;;  %v827_v1 = vmov 0   ;;  %vm92_vm1 = vcmask 1043456  }
  0x35   :  { %615 = vmatprep.subr.bf16.mxu0 %v825_v0  ;;  %617 = vmatprep.mubr.msk.bf16.mxu0 %vm826_vm0, %v825_v0  ;;  %v703_v2 = vld [vmem:[#allocation9 + $0x14] ss:$8 sps:$4 sm:$0xff]   ;;  %s291_s5 = ssub.f32 1.0, %s980_s0  ;;  %v87_v3 = vld [vmem:[%s983_s3] sm:$0xf]  ;;  %vm88_vm2 = vcmask 64512   ;;  %v893_v11 = vstv %s980_s0 }
  0x36   :  { %203 = vmatprep.mubr.bf16.mxu1 %v827_v1  ;;  %v705_v4 = vld [vmem:[#allocation9 + $0x10] ss:$8 sps:$4 sm:$0xff]   ;;  %183 = vmatprep.subr.bf16.mxu1 %v703_v2  ;;  %v94_v5 = vsel %vm92_vm1, %v87_v3, 0  ;;  %v706_v6 = vld [vmem:[#allocation9 + $0x4] ss:$8 sps:$4 sm:$0xff]   ;;  %vm167_vm3 = vcmask 261120  }
  0x37   :  { %616 = vmatpush3.bf16.msra.mxu0 %v94_v5  ;;  %184 = vmatpush1.bf16.msra.mxu1 %v705_v4  ;;  %v86_v7 = vld [vmem:[#allocation7] sm:$0xf]  ;;  %v708_v8 = vld [vmem:[#allocation9] ss:$8 sps:$4 sm:$0xff]   ;;  %v896_v13 = vstv %s291_s5  ;;  %v569_v14 = vld [vmem:[#allocation10 + $0x30] sm:$0xff]   ;;  %s828_s9 = smov [#allocation12]  }
  0x38   :  { %v570_v9 = vld [vmem:[#allocation10 + $0x38] sm:$0xff]   ;;  %185 = vmatprep.subr.bf16.mxu1 %v706_v6  ;;  %621 = vmatprep.subr.mxu0 %v825_v0  ;;  %v577_v15 = vld [vmem:[#allocation10 + $0x70] sm:$0xff]   ;;  %v527_v20 = vunpack.c.h.bf16 %v569_v14  ;;  %v576_v21 = vld [vmem:[#allocation10 + $0x68] sm:$0xff]   ;;  %v526_v30 = vunpack.c.l.bf16 %v569_v14  ;;  %s482_s10 = sshll.u32 %s828_s9, 4  ;;  %s483_s10 = int_to_ptr.vmem [resolvable:$true] %s482_s10 }
  0x39   :  { %v531_v10 = vunpack.c.h.bf16 %v570_v9  ;;  %v578_v12 = vld [vmem:[#allocation10 + $0x78] sm:$0xff]   ;;  %v530_v17 = vunpack.c.l.bf16 %v570_v9  ;;  %v559_v19 = vunpack.c.h.bf16 %v577_v15  ;;  %v558_v26 = vunpack.c.l.bf16 %v577_v15  ;;  %v568_v27 = vld [vmem:[#allocation10 + $0x28] sm:$0xff]   ;;  %v575_v32 = vld [vmem:[#allocation10 + $0x60] sm:$0xff]   ;;  %s789_s11 = scalar_lea.vmem %s483_s10, 128  ;;  %p794_p7 = scmp.lt.s32.totalorder %s483_s10, %s483_s10 }
  0x3a   :  { %v563_v16 = vunpack.c.h.bf16 %v578_v12  ;;  %v562_v18 = vunpack.c.l.bf16 %v578_v12  ;;  %618 = vmatmul.mubr.msk.bf16.vlgmr.msra.gmra.mxu0 %vm88_vm2, %v86_v7  ;;  %v142_v22 = vld [vmem:[#allocation4] sm:$0xf]  ;;  %v555_v31 = vunpack.c.h.bf16 %v576_v21  ;;  %v288_v33 = vmul.f32 %v527_v20, %v893_v11  ;;  %v567_v37 = vld [vmem:[#allocation10 + $0x20] sm:$0xff]   ;;  %v565_v56 = vld [vmem:[#allocation10 + $0x10] sm:$0xff]   ;;  %p790_p6 = scmp.ne.s32.totalorder %s483_s10, %s789_s11  ;;  %p795_p8 = scmp.lt.s32.totalorder %s789_s11, %s789_s11 }
  0x3b   :  { %186 = vmatpush1.bf16.msra.mxu1 %v708_v8  ;;  %v290_v23 = vmul.f32 %v531_v10, %v893_v11  ;;  %653 = vmatprep.mubr.msk.f32.mxu0 %vm826_vm0, %v825_v0  ;;  %v289_v28 = vmul.f32 %v530_v17, %v893_v11  ;;  %v322_v29 = vmul.f32 %v559_v19, %v896_v13  ;;  %v523_v35 = vunpack.c.h.bf16 %v568_v27  ;;  %v574_v42 = vld [vmem:[#allocation10 + $0x58] sm:$0xff]   ;;  %v573_v2 = vld [vmem:[#allocation10 + $0x50] sm:$0xff]   ;;  %v564_v5 = vld [vmem:[#allocation10 + $0x8] sm:$0xff]  }
  0x3c   :  { %v324_v24 = vmul.f32 %v563_v16, %v896_v13  ;;  %v323_v25 = vmul.f32 %v562_v18, %v896_v13  ;;  %656 = vmatprep.subr.mxu1 %v825_v0  ;;  %v321_v34 = vmul.f32 %v558_v26, %v896_v13  ;;  %v554_v36 = vunpack.c.l.bf16 %v576_v21  ;;  %v566_v47 = vld [vmem:[#allocation10 + $0x18] sm:$0xff]   ;;  %v572_v10 = vld [vmem:[#allocation10 + $0x48] sm:$0xff]   ;;  %v501_v17 = vld [vmem:[#allocation10] sm:$0xff]   ;;  %p796_p9 = por %p795_p8, %p794_p7 }
  0x3d   :  { %v287_v38 = vmul.f32 %v526_v30, %v893_v11  ;;  %v320_v39 = vmul.f32 %v555_v31, %v896_v13  ;;  %v522_v40 = vunpack.c.l.bf16 %v568_v27  ;;  %v551_v41 = vunpack.c.h.bf16 %v575_v32 }
  0x3e   :  { %622 = vmatpush3.msra.mxu0 %v324_v24  ;;  %498 = vmatmul.mubr.msk.bf16.vlgmr.msra.gmra.mxu1 %vm167_vm3, %v142_v22  ;;  %v286_v43 = vmul.f32 %v523_v35, %v893_v11  ;;  %v319_v44 = vmul.f32 %v554_v36, %v896_v13  ;;  %v519_v45 = vunpack.c.h.bf16 %v567_v37  ;;  %v550_v46 = vunpack.c.l.bf16 %v575_v32  ;;  %v571_v22 = vld [vmem:[#allocation10 + $0x40] sm:$0xff]   ;;  %v499_v35 = vld [vmem:[%s986_s6] ss:$0 sm:$0xff]  ;;  %p797_p10 = pnand %p796_p9, %p790_p6 }
  0x3f   :  { %623 = vmatprep.subr.mxu0 %v825_v0  ;;  %657 = vmatpush3.msra.mxu1 %v290_v23  ;;  %v285_v48 = vmul.f32 %v522_v40, %v893_v11  ;;  %v318_v49 = vmul.f32 %v551_v41, %v896_v13  ;;  %v518_v50 = vunpack.c.l.bf16 %v567_v37  ;;  %v547_v51 = vunpack.c.h.bf16 %v574_v42 }
  0x40   :  { %624 = vmatpush3.msra.mxu0 %v323_v25  ;;  %658 = vmatprep.subr.mxu1 %v825_v0  ;;  %v284_v52 = vmul.f32 %v519_v45, %v893_v11  ;;  %v317_v53 = vmul.f32 %v550_v46, %v896_v13  ;;  %v515_v54 = vunpack.c.h.bf16 %v566_v47  ;;  %v546_v55 = vunpack.c.l.bf16 %v574_v42  ;;  %v214_v45 = vld [vmem:[%s986_s6 + $0x2] sm:$0x1] }
  0x41   :  { %625 = vmatprep.subr.mxu0 %v825_v0  ;;  %659 = vmatpush3.msra.mxu1 %v289_v28  ;;  %v283_v57 = vmul.f32 %v518_v50, %v893_v11  ;;  %v316_v58 = vmul.f32 %v547_v51, %v896_v13  ;;  %v514_v59 = vunpack.c.l.bf16 %v566_v47  ;;  %v511_v62 = vunpack.c.h.bf16 %v565_v56 }
  0x42   :  { %626 = vmatpush3.msra.mxu0 %v322_v29  ;;  %660 = vmatprep.subr.mxu1 %v825_v0  ;;  %v282_v60 = vmul.f32 %v515_v54, %v893_v11  ;;  %v315_v61 = vmul.f32 %v546_v55, %v896_v13  ;;  %v543_v3 = vunpack.c.h.bf16 %v573_v2  ;;  %v510_v4 = vunpack.c.l.bf16 %v565_v56 }
  0x43   :  { %627 = vmatprep.subr.mxu0 %v825_v0  ;;  %661 = vmatpush3.msra.mxu1 %v288_v33  ;;  %v281_v63 = vmul.f32 %v514_v59, %v893_v11  ;;  %v280_v1 = vmul.f32 %v511_v62, %v893_v11  ;;  %v542_v8 = vunpack.c.l.bf16 %v573_v2  ;;  %v507_v9 = vunpack.c.h.bf16 %v564_v5 }
  0x44   :  { %628 = vmatpush3.msra.mxu0 %v321_v34  ;;  %662 = vmatprep.subr.mxu1 %v825_v0  ;;  %v314_v6 = vmul.f32 %v543_v3, %v896_v13  ;;  %v279_v7 = vmul.f32 %v510_v4, %v893_v11  ;;  %v539_v15 = vunpack.c.h.bf16 %v572_v10  ;;  %v506_v16 = vunpack.c.l.bf16 %v564_v5 }
  0x45   :  { %629 = vmatprep.subr.mxu0 %v825_v0  ;;  %663 = vmatpush3.msra.mxu1 %v287_v38  ;;  %v313_v12 = vmul.f32 %v542_v8, %v896_v13  ;;  %v278_v14 = vmul.f32 %v507_v9, %v893_v11  ;;  %v538_v20 = vunpack.c.l.bf16 %v572_v10  ;;  %v503_v21 = vunpack.c.h.bf16 %v501_v17 }
  0x46   :  { %630 = vmatpush3.msra.mxu0 %v320_v39  ;;  %664 = vmatprep.subr.mxu1 %v825_v0  ;;  %v312_v18 = vmul.f32 %v539_v15, %v896_v13  ;;  %v277_v19 = vmul.f32 %v506_v16, %v893_v11  ;;  %v535_v25 = vunpack.c.h.bf16 %v571_v22  ;;  %v502_v26 = vunpack.c.l.bf16 %v501_v17 }
  0x47   :  { %631 = vmatprep.subr.mxu0 %v825_v0  ;;  %665 = vmatpush3.msra.mxu1 %v286_v43  ;;  %v311_v23 = vmul.f32 %v538_v20, %v896_v13  ;;  %v276_v24 = vmul.f32 %v503_v21, %v893_v11  ;;  %v534_v29 = vunpack.c.l.bf16 %v571_v22  ;;  %v466_v47 = vmul.f32 %v896_v13, %v214_v45 }
  0x48   :  { %632 = vmatpush3.msra.mxu0 %v319_v44  ;;  %666 = vmatprep.subr.mxu1 %v825_v0  ;;  %v310_v27 = vmul.f32 %v535_v25, %v896_v13  ;;  %v275_v28 = vmul.f32 %v502_v26, %v893_v11  ;;  %v213_v44 = vld [vmem:[%s986_s6 + $0x1] sm:$0x1] }
  0x49   :  { %633 = vmatprep.subr.mxu0 %v825_v0  ;;  %667 = vmatpush3.msra.mxu1 %v285_v48  ;;  %v309_v30 = vmul.f32 %v534_v29, %v896_v13  ;;  %v465_v46 = vmul.f32 %v893_v11, %v213_v44 }
  0x4a   :  { %634 = vmatpush3.msra.mxu0 %v318_v49  ;;  %668 = vmatprep.subr.mxu1 %v825_v0 }
  0x4b   :  { %635 = vmatprep.subr.mxu0 %v825_v0  ;;  %669 = vmatpush3.msra.mxu1 %v284_v52  ;;  %v467_v49 = vadd.f32 %v466_v47, %v465_v46 }
  0x4c   :  { %636 = vmatpush3.msra.mxu0 %v317_v53  ;;  %670 = vmatprep.subr.mxu1 %v825_v0 }
  0x4d   :  { %637 = vmatprep.subr.mxu0 %v825_v0  ;;  %671 = vmatpush3.msra.mxu1 %v283_v57 }
  0x4e   :  { %638 = vmatpush3.msra.mxu0 %v316_v58  ;;  %672 = vmatprep.subr.mxu1 %v825_v0 }
  0x4f   :  { %639 = vmatprep.subr.mxu0 %v825_v0  ;;  %673 = vmatpush3.msra.mxu1 %v282_v60 }
  0x50   :  { %640 = vmatpush3.msra.mxu0 %v315_v61  ;;  %674 = vmatprep.subr.mxu1 %v825_v0 }
  0x51   :  { %641 = vmatprep.subr.mxu0 %v825_v0  ;;  %675 = vmatpush3.msra.mxu1 %v281_v63 }
  0x52   :  { %688 = vmatprep.mubr.msk.f32.mxu1 %vm826_vm0, %v825_v0  ;;  %676 = vmatprep.subr.mxu1 %v825_v0 }
  0x53   :  { %677 = vmatpush3.msra.mxu1 %v280_v1  ;;  %642 = vmatpush3.msra.mxu0 %v314_v6 }
  0x54   :  { %678 = vmatprep.subr.mxu1 %v825_v0  ;;  %643 = vmatprep.subr.mxu0 %v825_v0 }
  0x55   :  { %679 = vmatpush3.msra.mxu1 %v279_v7  ;;  %644 = vmatpush3.msra.mxu0 %v313_v12 }
  0x56   :  { %680 = vmatprep.subr.mxu1 %v825_v0  ;;  %645 = vmatprep.subr.mxu0 %v825_v0 }
  0x57   :  { %681 = vmatpush3.msra.mxu1 %v278_v14  ;;  %646 = vmatpush3.msra.mxu0 %v312_v18 }
  0x58   :  { %682 = vmatprep.subr.mxu1 %v825_v0  ;;  %647 = vmatprep.subr.mxu0 %v825_v0 }
  0x59   :  { %683 = vmatpush3.msra.mxu1 %v277_v19  ;;  %648 = vmatpush3.msra.mxu0 %v311_v23 }
  0x5a   :  { %684 = vmatprep.subr.mxu1 %v825_v0  ;;  %649 = vmatprep.subr.mxu0 %v825_v0 }
  0x5b   :  { %685 = vmatpush3.msra.mxu1 %v276_v24  ;;  %650 = vmatpush3.msra.mxu0 %v310_v27 }
  0x5c   :  { %686 = vmatprep.subr.mxu1 %v825_v0  ;;  %651 = vmatprep.subr.mxu0 %v825_v0  ;;  %v469_v0 = vlaneseq }
  0x5d   :  { %687 = vmatpush3.msra.mxu1 %v275_v28  ;;  %652 = vmatpush3.msra.mxu0 %v309_v30 }
  0x5e   :  { %v470_v48 = vshrl.u32 %v469_v0, 7 }
  0x60   :  { %v471_v50 = vsub.s32 0, %v470_v48 }
  0x62   :  { %v472_v52 = vrot.slane %v467_v49, %v471_v50 }
  0xfa   :  { %v130_v31 = vpop.f32.mrf.mxu0 }
  0xfc   :  { %v619_v32 = vpop.f32.mrf.mxu0 }
  0xfe   :  { %v133_v33 = vpop.f32.mrf.mxu0  ;;  %v205_v34 = vpop.f32.mrf.mxu1 }
  0xff   :  { %v216_v36 = vadd.f32 %v205_v34, %v130_v31 }
 0x100   :  { %v620_v37 = vpop.f32.mrf.mxu0  ;;  %v207_v38 = vpop.f32.mrf.mxu1 }
 0x101   :  { %v217_v39 = vmax.f32 %v216_v36, 0.0  ;;  %v224_v40 = vadd.f32 %v499_v35, %v207_v38 }
 0x102   :  { %v209_v41 = vpop.f32.mrf.mxu1 }
 0x103   :  { %v225_v42 = vmax.f32 %v224_v40, 0.0  ;;  %689 = vmatmul.mubr.f32.vlgmr.msra.gmra.mxu1 %v217_v39 }
 0x104   :  { %v210_v43 = vpop.f32.mrf.mxu1 }
 0x105   :  { %654 = vmatmul.mubr.f32.vlgmr.msra.gmra.mxu0 %v225_v42 }
 0x1c3   :  { %v461_v51 = vpop.f32.mrf.mxu1 }
 0x1c5   :  { %v391_v53 = vpop.f32.mrf.mxu0  ;;  %v690_v54 = vpop.f32.mrf.mxu1 }
 0x1c6   :  { %v462_v55 = vadd.f32 %v461_v51, %v391_v53 }
 0x1c7   :  { %v655_v56 = vpop.f32.mrf.mxu0 }
 0x1c8   :  { %v474_v57 = vadd.f32 %v472_v52, %v462_v55 }
 0x1ca   :  { %475 = vst [vmem:[#allocation12] sm:$0xff] %v474_v57 }
 0x1cb   :  { %800 = shalt.err (!%p797_p10)
}
 0x1cc   :  { %485 = dma.vmem_to_hbm [thread:$0]  %s483_s10, 128, %s987_s7, [#allocation6]  }
 0x1cd   :  { %815 = dma.done.wait [#allocation6], 128  }
 0x1ce   :  { %816 = vsyncadd [#allocation6], 4294967168 }
 0x1cf   :  { %489 = vsyncpa [#allocation5], 1 }
 0x1d0   :  { %490 = vsyncpa [#allocation8], 1 }
 0x1d1   :  { %491 = vsyncpa [#allocation11], 1 }
 0x1d2   :  { %492 = vsyncpa [#allocation6], 1 }

</bundles_post_ra>
